<compile_context>
chip_gen: v5e
topology: v5e:2x2
jax: 0.10.0
libtpu: 0.0.40
codegen_flags: <defaults>
</compile_context>

<pallas_src>
import jax
import jax.numpy as jnp
from jax.experimental import pallas as pl
from jax.experimental.pallas import tpu as pltpu


def _log_sigmoid(x):
    # numerically stable log(sigmoid(x)) = min(x, 0) - log1p(exp(-|x|))
    return jnp.minimum(x, 0.0) - jnp.log1p(jnp.exp(-jnp.abs(x)))


def sgns_loss_kernel(c_ref, t_ref, n_ref, los_ref):
    # Blocks are (D, B_tile): projection dim on sublanes, batch on lanes.
    # Inputs are streamed bf16; all arithmetic is done in f32.
    c = c_ref[...].astype(jnp.float32)   # (D, Bt) center embeds
    t = t_ref[...].astype(jnp.float32)   # (D, Bt) target embeds
    n = n_ref[...].astype(jnp.float32)   # (D, Bt) sum over K of negative embeds

    # per-example scores, lane-dense (1, Bt)
    pos_score = jnp.sum(t * c, axis=0, keepdims=True)
    neg_score = -jnp.sum(n * c, axis=0, keepdims=True)

    los_ref[...] = _log_sigmoid(pos_score) + _log_sigmoid(neg_score)


def _round_up(x, m):
    return ((x + m - 1) // m) * m


def _choose_batch_tile(B, b_tile_max):
    """Lane-aligned batch tile, capped at b_tile_max, with >= 2 grid steps
    whenever B > 128 (so the 'parallel' grid axis shards across both
    TensorCores on v7x instead of collapsing to grid=(1,))."""
    half = _round_up((B + 1) // 2, 128)
    b_tile = max(128, min(b_tile_max, half))
    b_pad = _round_up(B, b_tile)
    return b_tile, b_pad


def sgns_forward(emb_v, emb_u, center_words, target_words, negative_words,
                 *, b_tile_max=2048):
    """Scalar SGNS loss == -mean(log_sigmoid(pos) + log_sigmoid(neg))."""
    B = center_words.shape[0]
    D = emb_v.shape[1]

    b_tile, b_pad = _choose_batch_tile(B, b_tile_max)
    pad = b_pad - B

    # Pre-transposed (D, V) tables (tiny) so the gathers write the lane-dense
    # (D, B) layout directly -- no materialized (B, D).T transposes in HBM.
    # Tables are cast to bf16 so the streamed operands are half the bytes.
    emb_v_t = emb_v.T.astype(jnp.bfloat16)            # (D, V)
    emb_u_t = emb_u.T.astype(jnp.bfloat16)            # (D, V)

    c_t = jnp.take(emb_v_t, center_words[:, 0], axis=1)   # (D, B)
    t_t = jnp.take(emb_u_t, target_words[:, 0], axis=1)   # (D, B)

    # Fold negatives over K before the kernel. This is algebraically identical
    # to the module (it sums the K negative scores BEFORE log_sigmoid), and
    # cuts the dominant negatives stream by K x.  Accumulate the fold in f32.
    K = negative_words.shape[1]
    neg_gather = jnp.take(emb_u_t, negative_words.reshape(-1), axis=1)  # (D, B*K)
    neg_gather = neg_gather.reshape(D, B, K)
    n_t = jnp.sum(neg_gather, axis=-1, dtype=jnp.float32).astype(jnp.bfloat16)  # (D, B)

    # Pad the batch (lane axis) to a multiple of the tile; padded lanes are
    # zeros -> log_sigmoid(0) = -log 2, sliced off before the final mean.
    if pad:
        c_t = jnp.pad(c_t, ((0, 0), (0, pad)))
        t_t = jnp.pad(t_t, ((0, 0), (0, pad)))
        n_t = jnp.pad(n_t, ((0, 0), (0, pad)))

    grid = (b_pad // b_tile,)
    in_spec = pl.BlockSpec((D, b_tile), lambda j: (0, j))
    los = pl.pallas_call(
        sgns_loss_kernel,
        out_shape=jax.ShapeDtypeStruct((1, b_pad), jnp.float32),
        grid=grid,
        in_specs=[in_spec, in_spec, in_spec],
        out_specs=pl.BlockSpec((1, b_tile), lambda j: (0, j)),
        compiler_params=pltpu.CompilerParams(
            dimension_semantics=("parallel",),
            # Explicit, generous-but-safe cap: 3 bf16 inputs x 2 pipeline
            # buffers x (D * b_tile * 2B) is well under this on all of
            # v5e (16 MiB default scoped) / v6e / v7x.
            vmem_limit_bytes=32 * 1024 * 1024,
        ),
    )(c_t, t_t, n_t)

    # Final reduction over the true batch size in glue (tiny).
    return -jnp.mean(los[0, :B])


def _reference_loss(emb_v, emb_u, center_words, target_words, negative_words):
    # Direct f32 transcription of the PyTorch module.
    c = jnp.take(emb_v, center_words[:, 0], axis=0)       # (B, D)
    t = jnp.take(emb_u, target_words[:, 0], axis=0)       # (B, D)
    n = -jnp.take(emb_u, negative_words, axis=0)          # (B, K, D)
    pos = jnp.sum(t * c, axis=-1, keepdims=True)                              # (B, 1)
    neg = jnp.sum(jnp.einsum("bkd,bd->bk", n, c), axis=1, keepdims=True)      # (B, 1)
    los = jax.nn.log_sigmoid(pos) + jax.nn.log_sigmoid(neg)
    return -jnp.mean(los)


if __name__ == "__main__":
    key = jax.random.PRNGKey(0)
    vocab_size, projection_dim = 50, 32
    B, K = 1000, 6   # B=1000 -> tile 512, 2-step grid (exercises tiling + padding)

    init_range = (2.0 / (vocab_size + projection_dim)) ** 0.5
    k1, k2, k3, k4, k5 = jax.random.split(key, 5)
    emb_v = jax.random.uniform(
        k1, (vocab_size, projection_dim), jnp.float32, -init_range, init_range)
    emb_u = jax.random.uniform(
        k2, (vocab_size, projection_dim), jnp.float32, -init_range, init_range)

    center_words = jax.random.randint(k3, (B, 1), 0, vocab_size, dtype=jnp.int32)
    target_words = jax.random.randint(k4, (B, 1), 0, vocab_size, dtype=jnp.int32)
    negative_words = jax.random.randint(k5, (B, K), 0, vocab_size, dtype=jnp.int32)

    loss = jax.jit(sgns_forward)(emb_v, emb_u, center_words, target_words,
                                 negative_words)
    jax.block_until_ready(loss)

    ref = _reference_loss(emb_v, emb_u, center_words, target_words, negative_words)
    # Tolerance loosened vs pure-f32 check: inputs are streamed as bf16
    # (accumulation stays f32), reference is full f32.
    assert jnp.allclose(loss, ref, rtol=1e-3, atol=1e-3), (loss, ref)

    print("KERNEL_OK")
</pallas_src>

<mosaic_0001>
module attributes {stable_mosaic.version = 11 : i64} {
  func.func @sgns_loss_kernel(%arg0: i32, %arg1: memref<32x512xbf16, #tpu.memory_space<vmem>>, %arg2: memref<32x512xbf16, #tpu.memory_space<vmem>>, %arg3: memref<32x512xbf16, #tpu.memory_space<vmem>>, %arg4: memref<1x512xf32, #tpu.memory_space<vmem>>) attributes {dimension_semantics = [#tpu.dimension_semantics<parallel>], iteration_bounds = array<i64: 2>, scalar_prefetch = 0 : i64, scratch_operands = 0 : i64, tpu.core_type = #tpu.core_type<tc>, window_params = [{transform_indices = @transform_0, window_bounds = array<i64: 32, 512>}, {transform_indices = @transform_1, window_bounds = array<i64: 32, 512>}, {transform_indices = @transform_2, window_bounds = array<i64: 32, 512>}, {transform_indices = @transform_3, window_bounds = array<i64: 1, 512>}]} {
    %c0 = arith.constant 0 : index
    %c0_0 = arith.constant 0 : index
    %0 = vector.load %arg1[%c0, %c0_0] : memref<32x512xbf16, #tpu.memory_space<vmem>>, vector<32x512xbf16>
    %1 = arith.extf %0 : vector<32x512xbf16> to vector<32x512xf32>
    %c0_1 = arith.constant 0 : index
    %c0_2 = arith.constant 0 : index
    %2 = vector.load %arg2[%c0_1, %c0_2] : memref<32x512xbf16, #tpu.memory_space<vmem>>, vector<32x512xbf16>
    %3 = arith.extf %2 : vector<32x512xbf16> to vector<32x512xf32>
    %c0_3 = arith.constant 0 : index
    %c0_4 = arith.constant 0 : index
    %4 = vector.load %arg3[%c0_3, %c0_4] : memref<32x512xbf16, #tpu.memory_space<vmem>>, vector<32x512xbf16>
    %5 = arith.extf %4 : vector<32x512xbf16> to vector<32x512xf32>
    %6 = arith.mulf %3, %1 : vector<32x512xf32>
    %cst = arith.constant dense<0.000000e+00> : vector<512xf32>
    %7 = vector.multi_reduction <add>, %6, %cst [0] : vector<32x512xf32> to vector<512xf32>
    %8 = vector.shape_cast %7 : vector<512xf32> to vector<1x512xf32>
    %9 = arith.mulf %5, %1 : vector<32x512xf32>
    %cst_5 = arith.constant dense<0.000000e+00> : vector<512xf32>
    %10 = vector.multi_reduction <add>, %9, %cst_5 [0] : vector<32x512xf32> to vector<512xf32>
    %11 = vector.shape_cast %10 : vector<512xf32> to vector<1x512xf32>
    %cst_6 = arith.constant 0.000000e+00 : f32
    %12 = vector.broadcast %cst_6 : f32 to vector<1x512xf32>
    %13 = arith.subf %12, %11 : vector<1x512xf32>
    %cst_7 = arith.constant 0.000000e+00 : f32
    %14 = vector.broadcast %cst_7 : f32 to vector<1x512xf32>
    %15 = arith.minimumf %8, %14 : vector<1x512xf32>
    %16 = math.absf %8 : vector<1x512xf32>
    %cst_8 = arith.constant 0.000000e+00 : f32
    %17 = vector.broadcast %cst_8 : f32 to vector<1x512xf32>
    %18 = arith.subf %17, %16 : vector<1x512xf32>
    %19 = math.exp %18 : vector<1x512xf32>
    %20 = math.log1p %19 : vector<1x512xf32>
    %21 = arith.subf %15, %20 : vector<1x512xf32>
    %cst_9 = arith.constant 0.000000e+00 : f32
    %22 = vector.broadcast %cst_9 : f32 to vector<1x512xf32>
    %23 = arith.minimumf %13, %22 : vector<1x512xf32>
    %24 = math.absf %13 : vector<1x512xf32>
    %cst_10 = arith.constant 0.000000e+00 : f32
    %25 = vector.broadcast %cst_10 : f32 to vector<1x512xf32>
    %26 = arith.subf %25, %24 : vector<1x512xf32>
    %27 = math.exp %26 : vector<1x512xf32>
    %28 = math.log1p %27 : vector<1x512xf32>
    %29 = arith.subf %23, %28 : vector<1x512xf32>
    %30 = arith.addf %21, %29 : vector<1x512xf32>
    %c0_11 = arith.constant 0 : index
    %c0_12 = arith.constant 0 : index
    %31 = vector.load %arg4[%c0_11, %c0_12] : memref<1x512xf32, #tpu.memory_space<vmem>>, vector<1x512xf32>
    tpu.vector_store %arg4[%c0_11, %c0_12], %30 {strides = array<i32>} : memref<1x512xf32, #tpu.memory_space<vmem>>, vector<1x512xf32>,
    return
  }
  func.func @transform_0(%arg0: i32) -> (i32, i32) {
    %c0_i32 = arith.constant 0 : i32
    %c0_i32_0 = arith.constant 0 : i32
    return %c0_i32, %arg0 : i32, i32
  }
  func.func @transform_1(%arg0: i32) -> (i32, i32) {
    %c0_i32 = arith.constant 0 : i32
    %c0_i32_0 = arith.constant 0 : i32
    return %c0_i32, %arg0 : i32, i32
  }
  func.func @transform_2(%arg0: i32) -> (i32, i32) {
    %c0_i32 = arith.constant 0 : i32
    %c0_i32_0 = arith.constant 0 : i32
    return %c0_i32, %arg0 : i32, i32
  }
  func.func @transform_3(%arg0: i32) -> (i32, i32) {
    %c0_i32 = arith.constant 0 : i32
    %c0_i32_0 = arith.constant 0 : i32
    return %c0_i32, %arg0 : i32, i32
  }
}

</mosaic_0001>

<bundles_post_ra>
// kernel: sgns_forward.1
= control target key start
LH: loop header
LB: loop body
LE: loop exit
PB: predicated region body
PF: predicated region fallthrough
CT: control target
= control target key end

     0   :  { %s853_s12 = smov 0   ;;  %s855_s13 = smov 0   ;;  %s1116_s0 = inlined_call_operand.vmem [shape: bf16[32,1024], index: 0, kind: input, shape index: {}]   ;;  %s1117_s1 = inlined_call_operand.vmem [shape: bf16[32,1024], index: 1, kind: input, shape index: {}]   ;;  %s1118_s2 = inlined_call_operand.vmem [shape: bf16[32,1024], index: 2, kind: input, shape index: {}]   ;;  %s1119_s3 = inlined_call_operand.vmem [shape: f32[1,1024], index: 3, kind: output, shape index: {}]  }
   0x1   :  { %s857_s14 = smov 0  }
   0x2 LB: > { %s730_s15 = sadd.s32 4294967295, %s831_s14   ;;  %s870_s16 = sadd.s32 1, %s831_s14   ;;  %s831_s14 = sphi %s857_s14, %s1143_s14   ;;  %s827_s13 = sphi %s855_s13, %s1142_s13   ;;  %s823_s12 = sphi %s853_s12, %s1141_s12  }
   0x3   : > { %s17_s17 = ssub.s32 %s831_s14, %s870_s16  ;;  %s20_s18 = sadd.s32 1, %s827_s13 }
   0x4   : > { %p18_p0 = scmp.eq.s32.totalorder %s17_s17, 0  ;;  %p27_p1 = scmp.ne.s32.totalorder %s827_s13, %s823_s12 }
   0x5   : > { %p28_p2 = scmp.eq.s32.totalorder %s831_s14, 0  ;;  %p733_p4 = scmp.ge.s32.totalorder %s831_s14, 2 }
   0x6   : > { %s879_s19 = scalar_select %p18_p0, %s827_s13, %s20_s18  }
   0x7   : > { %p881_p3 = por %p28_p2, %p27_p1  ;;  %131 = sbr.rel (%p733_p4) target bundleno = 48 (0x30), region = 16 }
   0xc   : > { %134 = sbr.rel (!%p881_p3) target bundleno = 24 (0x18), region = 20  ;;  %s136_s21 = sand.u32 (%p881_p3), 1, %s827_s13  }
   0xd   : > { %s750_s22 = sshll.u32 (%p881_p3), %s831_s14, 4  ;;  %s734_s23 = sshll.u32 (%p881_p3), %s136_s21, 6 }
   0xe   : > { %s141_s26 = scalar_lea.vmem (%p881_p3), %s1116_s0, %s750_s22  ;;  %s138_s27 = scalar_lea.vmem (%p881_p3), [#allocation2], %s734_s23 }
   0xf   : > { %v154_v0 = vld [vmem:[%s141_s26] sm:$0xff] (%p881_p3)  ;;  %v156_v1 = vld [vmem:[%s141_s26 + $0x8] sm:$0xff] (%p881_p3) }
  0x10   : > { %v158_v2 = vld [vmem:[%s141_s26 + $0x20] sm:$0xff] (%p881_p3)  ;;  %155 = vst [vmem:[%s138_s27] sm:$0xff] (%p881_p3), %v154_v0  ;;  %v160_v3 = vld [vmem:[%s141_s26 + $0x28] sm:$0xff] (%p881_p3) }
  0x11   : > { %157 = vst [vmem:[%s138_s27 + $0x8] sm:$0xff] %v156_v1  ;;  %v162_v4 = vld [vmem:[%s141_s26 + $0x40] sm:$0xff]  ;;  %v164_v5 = vld [vmem:[%s141_s26 + $0x48] sm:$0xff] }
  0x12   : > { %159 = vst [vmem:[%s138_s27 + $0x10] sm:$0xff] %v158_v2  ;;  %v166_v6 = vld [vmem:[%s141_s26 + $0x60] sm:$0xff]  ;;  %v168_v7 = vld [vmem:[%s141_s26 + $0x68] sm:$0xff] }
  0x13   : > { %161 = vst [vmem:[%s138_s27 + $0x18] sm:$0xff] %v160_v3 }
  0x14   : > { %163 = vst [vmem:[%s138_s27 + $0x20] sm:$0xff] %v162_v4 }
  0x15   : > { %165 = vst [vmem:[%s138_s27 + $0x28] sm:$0xff] %v164_v5 }
  0x16   : > { %167 = vst [vmem:[%s138_s27 + $0x30] sm:$0xff] %v166_v6 }
  0x17   : > { %169 = vst [vmem:[%s138_s27 + $0x38] sm:$0xff] %v168_v7 }
  0x18 PF: > { %175 = sbr.rel (!%p881_p3) target bundleno = 36 (0x24), region = 43  ;;  %s177_s28 = sand.u32 (%p881_p3), 1, %s827_s13  }
  0x19   : > { %s751_s29 = sshll.u32 (%p881_p3), %s831_s14, 4  ;;  %s737_s30 = sshll.u32 (%p881_p3), %s177_s28, 6 }
  0x1a   : > { %s182_s6 = scalar_lea.vmem (%p881_p3), %s1117_s1, %s751_s29  ;;  %s179_s7 = scalar_lea.vmem (%p881_p3), [#allocation3], %s737_s30 }
  0x1b   : > { %v195_v8 = vld [vmem:[%s182_s6] sm:$0xff] (%p881_p3)  ;;  %v197_v9 = vld [vmem:[%s182_s6 + $0x8] sm:$0xff] (%p881_p3) }
  0x1c   : > { %v199_v10 = vld [vmem:[%s182_s6 + $0x20] sm:$0xff] (%p881_p3)  ;;  %196 = vst [vmem:[%s179_s7] sm:$0xff] (%p881_p3), %v195_v8  ;;  %v201_v11 = vld [vmem:[%s182_s6 + $0x28] sm:$0xff] (%p881_p3) }
  0x1d   : > { %198 = vst [vmem:[%s179_s7 + $0x8] sm:$0xff] %v197_v9  ;;  %v203_v12 = vld [vmem:[%s182_s6 + $0x40] sm:$0xff]  ;;  %v205_v13 = vld [vmem:[%s182_s6 + $0x48] sm:$0xff] }
  0x1e   : > { %200 = vst [vmem:[%s179_s7 + $0x10] sm:$0xff] %v199_v10  ;;  %v207_v14 = vld [vmem:[%s182_s6 + $0x60] sm:$0xff]  ;;  %v209_v15 = vld [vmem:[%s182_s6 + $0x68] sm:$0xff] }
  0x1f   : > { %202 = vst [vmem:[%s179_s7 + $0x18] sm:$0xff] %v201_v11 }
  0x20   : > { %204 = vst [vmem:[%s179_s7 + $0x20] sm:$0xff] %v203_v12 }
  0x21   : > { %206 = vst [vmem:[%s179_s7 + $0x28] sm:$0xff] %v205_v13 }
  0x22   : > { %208 = vst [vmem:[%s179_s7 + $0x30] sm:$0xff] %v207_v14 }
  0x23   : > { %210 = vst [vmem:[%s179_s7 + $0x38] sm:$0xff] %v209_v15 }
  0x24 PF: > { %216 = sbr.rel (!%p881_p3) target bundleno = 48 (0x30), region = 66  ;;  %s218_s8 = sand.u32 (%p881_p3), 1, %s827_s13  }
  0x25   : > { %s752_s9 = sshll.u32 (%p881_p3), %s831_s14, 4  ;;  %s740_s10 = sshll.u32 (%p881_p3), %s218_s8, 6 }
  0x26   : > { %s223_s18 = scalar_lea.vmem (%p881_p3), %s1118_s2, %s752_s9  ;;  %s220_s21 = scalar_lea.vmem (%p881_p3), [#allocation4], %s740_s10 }
  0x27   : > { %v236_v16 = vld [vmem:[%s223_s18] sm:$0xff] (%p881_p3)  ;;  %v238_v17 = vld [vmem:[%s223_s18 + $0x8] sm:$0xff] (%p881_p3) }
  0x28   : > { %v240_v18 = vld [vmem:[%s223_s18 + $0x20] sm:$0xff] (%p881_p3)  ;;  %237 = vst [vmem:[%s220_s21] sm:$0xff] (%p881_p3), %v236_v16  ;;  %v242_v19 = vld [vmem:[%s223_s18 + $0x28] sm:$0xff] (%p881_p3) }
  0x29   : > { %239 = vst [vmem:[%s220_s21 + $0x8] sm:$0xff] %v238_v17  ;;  %v244_v20 = vld [vmem:[%s223_s18 + $0x40] sm:$0xff]  ;;  %v246_v21 = vld [vmem:[%s223_s18 + $0x48] sm:$0xff] }
  0x2a   : > { %241 = vst [vmem:[%s220_s21 + $0x10] sm:$0xff] %v240_v18  ;;  %v248_v22 = vld [vmem:[%s223_s18 + $0x60] sm:$0xff]  ;;  %v250_v23 = vld [vmem:[%s223_s18 + $0x68] sm:$0xff] }
  0x2b   : > { %243 = vst [vmem:[%s220_s21 + $0x18] sm:$0xff] %v242_v19 }
  0x2c   : > { %245 = vst [vmem:[%s220_s21 + $0x20] sm:$0xff] %v244_v20 }
  0x2d   : > { %247 = vst [vmem:[%s220_s21 + $0x28] sm:$0xff] %v246_v21 }
  0x2e   : > { %249 = vst [vmem:[%s220_s21 + $0x30] sm:$0xff] %v248_v22 }
  0x2f   : > { %251 = vst [vmem:[%s220_s21 + $0x38] sm:$0xff] %v250_v23 }
  0x30 PF: > { %p743_p5 = scmp.ge.s32.totalorder %s831_s14, 1  ;;  %p256_p6 = scmp.lt.s32.totalorder %s831_s14, 3 }
  0x32   : > { %p257_p7 = pnand %p743_p5, %p256_p6 }
  0x33   : > { %s263_s20 = sand.u32 (!%p257_p7), 1, %s823_s12   ;;  %s747_s25 = sshll.u32 (!%p257_p7), %s730_s15, 2 }
  0x34   : > { %260 = sbr.rel (%p257_p7) target bundleno = 142 (0x8e), region = 89  ;;  %s910_s22 = sshll.u32 (!%p257_p7), %s263_s20, 6 }
  0x35   : > { %s265_s23 = scalar_lea.vmem (!%p257_p7), [#allocation2], %s910_s22  ;;  %s272_s12 = scalar_lea.vmem (!%p257_p7), [#allocation3], %s910_s22 }
  0x36   : > { %s279_s24 = scalar_lea.vmem (!%p257_p7), [#allocation4], %s910_s22  ;;  %p311_p8 = scmp.lt.s32.totalorder (!%p257_p7), %s747_s25, 7 }
  0x39   : > { %v913_v24 = vld [vmem:[%s265_s23] sm:$0xff]  ;;  %v915_v25 = vld [vmem:[%s265_s23 + $0x8] sm:$0xff]  ;;  %v917_v26 = vld [vmem:[%s265_s23 + $0x10] sm:$0xff]  ;;  %s1145_s25 = smov (!%p311_p8, %s747_s25), 7  ;;  %vm626_vm8 = vcmask 1040384   ;;  %vm628_vm9 = vcmask 1042434  }
  0x3a   : > { %v919_v27 = vld [vmem:[%s265_s23 + $0x18] sm:$0xff]  ;;  %v921_v28 = vld [vmem:[%s265_s23 + $0x20] sm:$0xff]  ;;  %v923_v29 = vld [vmem:[%s265_s23 + $0x28] sm:$0xff]  ;;  %v323_v30 = vunpack.c.l.bf16 %v913_v24  ;;  %v324_v31 = vunpack.c.h.bf16 %v913_v24  ;;  %v325_v32 = vunpack.c.l.bf16 %v915_v25  ;;  %v326_v33 = vunpack.c.h.bf16 %v915_v25  ;;  %s313_s26 = scalar_lea.vmem %s1119_s3, %s1145_s25 }
  0x3b   : > { %v929_v34 = vld [vmem:[%s265_s23 + $0x30] sm:$0xff]  ;;  %v931_v35 = vld [vmem:[%s265_s23 + $0x38] sm:$0xff]  ;;  %v327_v36 = vunpack.c.l.bf16 %v917_v26  ;;  %v328_v37 = vunpack.c.h.bf16 %v917_v26  ;;  %v329_v38 = vunpack.c.l.bf16 %v919_v27  ;;  %v330_v39 = vunpack.c.h.bf16 %v919_v27  ;;  %v339_v40 = vld [vmem:[%s272_s12] sm:$0xff] }
  0x3c   : > { %v1121_v41 = vunpack.c.l.bf16 %v921_v28  ;;  %v1120_v42 = vunpack.c.h.bf16 %v921_v28  ;;  %v333_v43 = vunpack.c.l.bf16 %v923_v29  ;;  %v334_v44 = vunpack.c.h.bf16 %v923_v29  ;;  %v340_v45 = vld [vmem:[%s272_s12 + $0x8] sm:$0xff]  ;;  %v341_v46 = vld [vmem:[%s272_s12 + $0x10] sm:$0xff]  ;;  %v342_v47 = vld [vmem:[%s272_s12 + $0x18] sm:$0xff] }
  0x3d   : > { %v335_v48 = vunpack.c.l.bf16 %v929_v34  ;;  %v1123_v49 = vunpack.c.h.bf16 %v929_v34  ;;  %v1122_v50 = vunpack.c.l.bf16 %v931_v35  ;;  %v338_v51 = vunpack.c.h.bf16 %v931_v35  ;;  %v343_v52 = vld [vmem:[%s272_s12 + $0x20] sm:$0xff]  ;;  %v344_v53 = vld [vmem:[%s272_s12 + $0x28] sm:$0xff]  ;;  %v345_v54 = vld [vmem:[%s272_s12 + $0x30] sm:$0xff] }
  0x3e   : > { %v346_v55 = vld [vmem:[%s272_s12 + $0x38] sm:$0xff]  ;;  %v347_v56 = vunpack.c.l.bf16 %v339_v40  ;;  %v348_v57 = vunpack.c.h.bf16 %v339_v40  ;;  %v349_v58 = vunpack.c.l.bf16 %v340_v45  ;;  %v350_v59 = vunpack.c.h.bf16 %v340_v45  ;;  %v363_v0 = vld [vmem:[%s279_s24] sm:$0xff]  ;;  %v364_v1 = vld [vmem:[%s279_s24 + $0x8] sm:$0xff] }
  0x3f   : > { %v351_v60 = vunpack.c.l.bf16 %v341_v46  ;;  %v352_v61 = vunpack.c.h.bf16 %v341_v46  ;;  %v353_v62 = vunpack.c.l.bf16 %v342_v47  ;;  %v354_v63 = vunpack.c.h.bf16 %v342_v47  ;;  %v365_v6 = vld [vmem:[%s279_s24 + $0x10] sm:$0xff]  ;;  %v366_v7 = vld [vmem:[%s279_s24 + $0x18] sm:$0xff]  ;;  %v367_v12 = vld [vmem:[%s279_s24 + $0x20] sm:$0xff] }
  0x40   : > { %v355_v2 = vunpack.c.l.bf16 %v343_v52  ;;  %v356_v3 = vunpack.c.h.bf16 %v343_v52  ;;  %v357_v4 = vunpack.c.l.bf16 %v344_v53  ;;  %v358_v5 = vunpack.c.h.bf16 %v344_v53  ;;  %v368_v13 = vld [vmem:[%s279_s24 + $0x28] sm:$0xff]  ;;  %v947_v14 = vld [vmem:[%s279_s24 + $0x30] sm:$0xff]  ;;  %v949_v15 = vld [vmem:[%s279_s24 + $0x38] sm:$0xff] }
  0x41   : > { %v359_v8 = vunpack.c.l.bf16 %v345_v54  ;;  %v360_v9 = vunpack.c.h.bf16 %v345_v54  ;;  %v361_v10 = vunpack.c.l.bf16 %v346_v55  ;;  %v362_v11 = vunpack.c.h.bf16 %v346_v55 }
  0x42   : > { %v371_v16 = vunpack.c.l.bf16 %v363_v0  ;;  %v372_v17 = vunpack.c.h.bf16 %v363_v0  ;;  %v373_v18 = vunpack.c.l.bf16 %v364_v1  ;;  %v374_v19 = vunpack.c.h.bf16 %v364_v1 }
  0x43   : > { %v375_v20 = vunpack.c.l.bf16 %v365_v6  ;;  %v376_v21 = vunpack.c.h.bf16 %v365_v6  ;;  %v377_v22 = vunpack.c.l.bf16 %v366_v7  ;;  %v378_v23 = vunpack.c.h.bf16 %v366_v7 }
  0x44   : > { %v379_v40 = vunpack.c.l.bf16 %v367_v12  ;;  %v380_v45 = vunpack.c.h.bf16 %v367_v12  ;;  %v381_v46 = vunpack.c.l.bf16 %v368_v13  ;;  %v382_v47 = vunpack.c.h.bf16 %v368_v13 }
  0x45   : > { %v383_v52 = vunpack.c.l.bf16 %v947_v14  ;;  %v384_v53 = vunpack.c.h.bf16 %v947_v14  ;;  %v385_v54 = vunpack.c.l.bf16 %v949_v15  ;;  %v386_v55 = vunpack.c.h.bf16 %v949_v15 }
  0x46   : > { %v387_v0 = vmul.f32 %v347_v56, %v323_v30  ;;  %v388_v1 = vmul.f32 %v348_v57, %v324_v31  ;;  %v389_v6 = vmul.f32 %v349_v58, %v325_v32  ;;  %v390_v7 = vmul.f32 %v350_v59, %v326_v33 }
  0x47   : > { %v391_v12 = vmul.f32 %v351_v60, %v327_v36  ;;  %v392_v13 = vmul.f32 %v352_v61, %v328_v37  ;;  %v393_v14 = vmul.f32 %v353_v62, %v329_v38  ;;  %v394_v56 = vmul.f32 %v354_v63, %v330_v39 }
  0x48   : > { %v395_v57 = vmul.f32 %v355_v2, %v1121_v41  ;;  %v396_v58 = vmul.f32 %v356_v3, %v1120_v42  ;;  %v397_v59 = vmul.f32 %v357_v4, %v333_v43  ;;  %v398_v60 = vmul.f32 %v358_v5, %v334_v44 }
  0x49   : > { %v399_v61 = vmul.f32 %v359_v8, %v335_v48  ;;  %v400_v62 = vmul.f32 %v360_v9, %v1123_v49  ;;  %v401_v63 = vmul.f32 %v361_v10, %v1122_v50  ;;  %v402_v2 = vmul.f32 %v362_v11, %v338_v51 }
  0x4a   : > { %v403_v15 = vadd.f32 %v391_v12, %v387_v0  ;;  %v412_v3 = vadd.f32 %v392_v13, %v388_v1  ;;  %v421_v42 = vadd.f32 %v393_v14, %v389_v6  ;;  %v430_v41 = vadd.f32 %v394_v56, %v390_v7 }
  0x4b   : > { %v439_v4 = vmul.f32 %v371_v16, %v323_v30  ;;  %v440_v5 = vmul.f32 %v372_v17, %v324_v31  ;;  %v441_v8 = vmul.f32 %v373_v18, %v325_v32  ;;  %v442_v9 = vmul.f32 %v374_v19, %v326_v33 }
  0x4c   : > { %v404_v10 = vadd.f32 %v403_v15, %v395_v57  ;;  %v413_v50 = vadd.f32 %v412_v3, %v396_v58  ;;  %v422_v49 = vadd.f32 %v421_v42, %v397_v59  ;;  %v431_v11 = vadd.f32 %v430_v41, %v398_v60 }
  0x4d   : > { %v443_v0 = vmul.f32 %v375_v20, %v327_v36  ;;  %v444_v1 = vmul.f32 %v376_v21, %v328_v37  ;;  %v445_v24 = vmul.f32 %v377_v22, %v329_v38  ;;  %v446_v30 = vmul.f32 %v378_v23, %v330_v39 }
  0x4e   : > { %v405_v31 = vadd.f32 %v404_v10, %v399_v61  ;;  %v414_v32 = vadd.f32 %v413_v50, %v400_v62  ;;  %v423_v25 = vadd.f32 %v422_v49, %v401_v63  ;;  %v432_v33 = vadd.f32 %v431_v11, %v402_v2 }
  0x4f   : > { %v1125_v16 = vunpack.c.l.bf16 %v921_v28  ;;  %v1126_v41 = vunpack.c.h.bf16 %v921_v28  ;;  %v449_v26 = vmul.f32 %v381_v46, %v333_v43  ;;  %v450_v36 = vmul.f32 %v382_v47, %v334_v44 }
  0x50   : > { %v406_v37 = vrot.slane %v405_v31, 4  ;;  %v415_v38 = vrot.slane %v414_v32, 4  ;;  %v424_v27 = vrot.slane %v423_v25, 4  ;;  %v433_v39 = vrot.slane %v432_v33, 4 }
  0x51   : > { %v447_v42 = vmul.f32 %v379_v40, %v1125_v16  ;;  %v448_v17 = vmul.f32 %v380_v45, %v1126_v41  ;;  %v451_v49 = vmul.f32 %v383_v52, %v335_v48  ;;  %v1127_v50 = vunpack.c.h.bf16 %v929_v34 }
  0x52   : > { %v1128_v19 = vunpack.c.l.bf16 %v931_v35  ;;  %v454_v20 = vmul.f32 %v386_v55, %v338_v51  ;;  %v407_v43 = vadd.f32 %v406_v37, %v405_v31  ;;  %v416_v21 = vadd.f32 %v415_v38, %v414_v32 }
  0x53   : > { %v452_v18 = vmul.f32 %v384_v53, %v1127_v50  ;;  %v425_v29 = vadd.f32 %v424_v27, %v423_v25  ;;  %v434_v44 = vadd.f32 %v433_v39, %v432_v33  ;;  %v455_v22 = vadd.f32 %v443_v0, %v439_v4 }
  0x54   : > { %v453_v28 = vmul.f32 %v385_v54, %v1128_v19  ;;  %v464_v23 = vadd.f32 %v444_v1, %v440_v5  ;;  %v473_v40 = vadd.f32 %v445_v24, %v441_v8  ;;  %v482_v45 = vadd.f32 %v446_v30, %v442_v9 }
  0x55   : > { %v408_v46 = vrot.slane %v407_v43, 2  ;;  %v417_v47 = vrot.slane %v416_v21, 2  ;;  %v426_v48 = vrot.slane %v425_v29, 2  ;;  %v435_v52 = vrot.slane %v434_v44, 2 }
  0x56   : > { %v456_v34 = vadd.f32 %v455_v22, %v447_v42  ;;  %v465_v53 = vadd.f32 %v464_v23, %v448_v17  ;;  %v474_v6 = vadd.f32 %v473_v40, %v449_v26  ;;  %v483_v7 = vadd.f32 %v482_v45, %v450_v36 }
  0x57   : > { %v409_v54 = vadd.f32 %v408_v46, %v407_v43  ;;  %v418_v12 = vadd.f32 %v417_v47, %v416_v21  ;;  %v427_v35 = vadd.f32 %v426_v48, %v425_v29  ;;  %v436_v51 = vadd.f32 %v435_v52, %v434_v44 }
  0x58   : > { %v457_v55 = vadd.f32 %v456_v34, %v451_v49  ;;  %v466_v13 = vadd.f32 %v465_v53, %v452_v18  ;;  %v475_v14 = vadd.f32 %v474_v6, %v453_v28  ;;  %v484_v56 = vadd.f32 %v483_v7, %v454_v20 }
  0x59   : > { %v410_v57 = vrot.slane %v409_v54, 1  ;;  %v419_v58 = vrot.slane %v418_v12, 1  ;;  %v428_v59 = vrot.slane %v427_v35, 1  ;;  %v437_v60 = vrot.slane %v436_v51, 1 }
  0x5a   : > { %v458_v61 = vrot.slane %v457_v55, 4  ;;  %v467_v62 = vrot.slane %v466_v13, 4  ;;  %v476_v63 = vrot.slane %v475_v14, 4  ;;  %v485_v2 = vrot.slane %v484_v56, 4 }
  0x5b   : > { %v1019_v15 = vadd.f32 %v410_v57, %v409_v54  ;;  %v1021_v3 = vadd.f32 %v419_v58, %v418_v12  ;;  %v1023_v4 = vadd.f32 %v428_v59, %v427_v35  ;;  %v1025_v11 = vadd.f32 %v437_v60, %v436_v51 }
  0x5c   : > { %v459_v5 = vadd.f32 %v458_v61, %v457_v55  ;;  %v468_v8 = vadd.f32 %v467_v62, %v466_v13  ;;  %v477_v9 = vadd.f32 %v476_v63, %v475_v14  ;;  %v486_v10 = vadd.f32 %v485_v2, %v484_v56 }
  0x5d   : > { %v499_v31 = vand.u32 2147483647, %v1019_v15  ;;  %v500_v32 = vand.u32 2147483647, %v1021_v3  ;;  %v501_v25 = vand.u32 2147483647, %v1023_v4 }
  0x5e   : > { %v460_v0 = vrot.slane %v459_v5, 2  ;;  %v469_v1 = vrot.slane %v468_v8, 2  ;;  %v478_v24 = vrot.slane %v477_v9, 2  ;;  %v487_v30 = vrot.slane %v486_v10, 2 }
  0x5f   : > { %v502_v17 = vand.u32 2147483647, %v1025_v11  ;;  %v503_v26 = vsub.f32 0.0, %v499_v31  ;;  %v504_v36 = vsub.f32 0.0, %v500_v32  ;;  %v505_v37 = vsub.f32 0.0, %v501_v25 }
  0x60   : > { %v461_v33 = vadd.f32 %v460_v0, %v459_v5  ;;  %v470_v16 = vadd.f32 %v469_v1, %v468_v8  ;;  %v479_v42 = vadd.f32 %v478_v24, %v477_v9  ;;  %v488_v41 = vadd.f32 %v487_v30, %v486_v10 }
  0x61   : > { %v506_v50 = vsub.f32 0.0, %v502_v17  ;;  %v507_v18 = vmul.f32 1.442695, %v503_v26  ;;  %v509_v19 = vmul.f32 1.442695, %v504_v36  ;;  %v495_v62 = vmin.f32 %v1019_v15, 0.0 }
  0x62   : > { %v462_v38 = vrot.slane %v461_v33, 1  ;;  %v471_v27 = vrot.slane %v470_v16, 1  ;;  %v480_v39 = vrot.slane %v479_v42, 1  ;;  %v489_v49 = vrot.slane %v488_v41, 1 }
  0x63   : > { %777 = vpow2.f32 %v507_v18  ;;  %v511_v22 = vmul.f32 1.442695, %v505_v37  ;;  %v513_v45 = vmul.f32 1.442695, %v506_v50  ;;  %v496_v9 = vmin.f32 %v1021_v3, 0.0 }
  0x64   : > { %v463_v28 = vadd.f32 %v462_v38, %v461_v33  ;;  %v472_v20 = vadd.f32 %v471_v27, %v470_v16  ;;  %v481_v43 = vadd.f32 %v480_v39, %v479_v42  ;;  %v1031_v21 = vadd.f32 %v489_v49, %v488_v41 }
  0x65   : > { %779 = vpow2.f32 %v509_v19  ;;  %v497_v10 = vmin.f32 %v1023_v4, 0.0  ;;  %v498_v25 = vmin.f32 %v1025_v11, 0.0  ;;  %vm630_vm10 = vcmask 1041408  }
  0x66   : > { %v491_v29 = vsub.f32 0.0, %v463_v28  ;;  %v492_v44 = vsub.f32 0.0, %v472_v20  ;;  %v493_v23 = vsub.f32 0.0, %v481_v43  ;;  %v494_v40 = vsub.f32 0.0, %v1031_v21 }
  0x67   : > { %781 = vpow2.f32 %v511_v22 }
  0x68   : > { %v559_v46 = vand.u32 2147483647, %v491_v29  ;;  %v560_v47 = vand.u32 2147483647, %v492_v44  ;;  %v561_v52 = vand.u32 2147483647, %v493_v23  ;;  %783 = vpow2.f32 %v513_v45 }
  0x69   : > { %v778_v48 = vpop.eup %777  ;;  %v562_v53 = vand.u32 2147483647, %v494_v40  ;;  %v1044_v16 = vmin.f32 %v491_v29, 0.0  ;;  %v1046_v42 = vmin.f32 %v492_v44, 0.0  ;;  %v1052_v36 = vmin.f32 %v493_v23, 0.0 }
  0x6a   : > { %v563_v34 = vsub.f32 0.0, %v559_v46  ;;  %v564_v6 = vsub.f32 0.0, %v560_v47  ;;  %v515_v54 = vadd.f32 1.0, %v778_v48  ;;  %v565_v35 = vsub.f32 0.0, %v561_v52 }
  0x6b   : > { %v780_v7 = vpop.eup %779  ;;  %v566_v13 = vsub.f32 0.0, %v562_v53  ;;  %v518_v56 = vmul.f32 -0.5, %v778_v48  ;;  %v521_v5 = vand.u32 2147483647, %v778_v48 }
  0x6c   : > { %v524_v12 = vadd.f32 1.0, %v780_v7  ;;  %v567_v51 = vmul.f32 1.442695, %v563_v34  ;;  %v569_v14 = vmul.f32 1.442695, %v564_v6  ;;  %785 = vlog2.f32 %v515_v54 }
  0x6d   : > { %v782_v55 = vpop.eup %781  ;;  %v527_v58 = vmul.f32 -0.5, %v780_v7  ;;  %v571_v61 = vmul.f32 1.442695, %v565_v35  ;;  %v573_v63 = vmul.f32 1.442695, %v566_v13  ;;  %v519_v2 = vadd.f32 1.0, %v518_v56 }
  0x6e   : > { %v1036_v57 = vpop.eup %783  ;;  %787 = vlog2.f32 %v524_v12  ;;  %v533_v59 = vadd.f32 1.0, %v782_v55  ;;  %v536_v60 = vmul.f32 -0.5, %v782_v55  ;;  %v530_v0 = vand.u32 2147483647, %v780_v7 }
  0x6f   : > { %789 = vpow2.f32 %v567_v51  ;;  %v542_v8 = vadd.f32 1.0, %v1036_v57  ;;  %v528_v24 = vadd.f32 1.0, %v527_v58  ;;  %v539_v31 = vand.u32 2147483647, %v782_v55 }
  0x70   : > { %791 = vpow2.f32 %v569_v14  ;;  %v537_v30 = vadd.f32 1.0, %v536_v60  ;;  %v545_v33 = vmul.f32 -0.5, %v1036_v57  ;;  %v520_v17 = vmul.f32 %v778_v48, %v519_v2 }
  0x71   : > { %793 = vpow2.f32 %v571_v61  ;;  %vm1048_vm0 = vcmp.lt.f32.partialorder %v521_v5, 0.0004427343  ;;  %vm1054_vm1 = vcmp.lt.f32.partialorder %v530_v0, 0.0004427343  ;;  %v548_v27 = vand.u32 2147483647, %v1036_v57 }
  0x72   : > { %795 = vpow2.f32 %v573_v63  ;;  %v786_v1 = vpop.eup %785  ;;  %v529_v18 = vmul.f32 %v780_v7, %v528_v24  ;;  %v538_v19 = vmul.f32 %v782_v55, %v537_v30  ;;  %vm1059_vm2 = vcmp.lt.f32.partialorder %v539_v31, 0.0004427343 }
  0x73   : > { %797 = vlog2.f32 %v533_v59  ;;  %v517_v29 = vmul.f32 0.6931472, %v786_v1  ;;  %v546_v44 = vadd.f32 1.0, %v545_v33  ;;  %vm1063_vm3 = vcmp.lt.f32.partialorder %v548_v27, 0.0004427343 }
  0x74   : > { %v788_v32 = vpop.eup %787  ;;  %799 = vlog2.f32 %v542_v8  ;;  %v558_v24 = vmin.f32 %v494_v40, 0.0 }
  0x75   : > { %v790_v41 = vpop.eup %789  ;;  %v526_v45 = vmul.f32 0.6931472, %v788_v32  ;;  %v523_v35 = vsel %vm1048_vm0, %v520_v17, %v517_v29  ;;  %v547_v55 = vmul.f32 %v1036_v57, %v546_v44 }
  0x76   : > { %v792_v37 = vpop.eup %791  ;;  %v575_v39 = vadd.f32 1.0, %v790_v41  ;;  %v578_v49 = vmul.f32 -0.5, %v790_v41  ;;  %v581_v52 = vand.u32 2147483647, %v790_v41  ;;  %v551_v33 = vsub.f32 %v495_v62, %v523_v35 }
  0x77   : > { %v794_v50 = vpop.eup %793  ;;  %v584_v20 = vadd.f32 1.0, %v792_v37  ;;  %v587_v22 = vmul.f32 -0.5, %v792_v37  ;;  %v590_v7 = vand.u32 2147483647, %v792_v37  ;;  %v532_v14 = vsel %vm1054_vm1, %v529_v18, %v526_v45 }
  0x78   : > { %v796_v43 = vpop.eup %795  ;;  %801 = vlog2.f32 %v575_v39  ;;  %v579_v46 = vadd.f32 1.0, %v578_v49  ;;  %v593_v47 = vadd.f32 1.0, %v794_v50  ;;  %v596_v53 = vmul.f32 -0.5, %v794_v50 }
  0x79   : > { %v798_v23 = vpop.eup %797  ;;  %803 = vlog2.f32 %v584_v20  ;;  %v588_v34 = vadd.f32 1.0, %v587_v22  ;;  %v602_v54 = vadd.f32 1.0, %v796_v43  ;;  %v605_v12 = vmul.f32 -0.5, %v796_v43 }
  0x7a   : > { %v800_v6 = vpop.eup %799  ;;  %805 = vlog2.f32 %v593_v47  ;;  %v535_v51 = vmul.f32 0.6931472, %v798_v23  ;;  %v597_v13 = vadd.f32 1.0, %v596_v53  ;;  %v580_v56 = vmul.f32 %v790_v41, %v579_v46 }
  0x7b   : > { %v599_v58 = vand.u32 2147483647, %v794_v50  ;;  %807 = vlog2.f32 %v602_v54  ;;  %v544_v60 = vmul.f32 0.6931472, %v800_v6  ;;  %vm1072_vm4 = vcmp.lt.f32.partialorder %v581_v52, 0.0004427343 }
  0x7c   : > { %v589_v63 = vmul.f32 %v792_v37, %v588_v34  ;;  %v606_v2 = vadd.f32 1.0, %v605_v12  ;;  %vm1076_vm5 = vcmp.lt.f32.partialorder %v590_v7, 0.0004427343  ;;  %v608_v0 = vand.u32 2147483647, %v796_v43 }
  0x7d   : > { %v541_v1 = vsel %vm1059_vm2, %v538_v19, %v535_v51  ;;  %v598_v31 = vmul.f32 %v794_v50, %v597_v13  ;;  %v552_v41 = vsub.f32 %v496_v9, %v532_v14  ;;  %vm600_vm6 = vcmp.lt.f32.partialorder %v599_v58, 0.0004427343 }
  0x7e   : > { %v802_v59 = vpop.eup %801  ;;  %v550_v26 = vsel %vm1063_vm3, %v547_v55, %v544_v60  ;;  %v607_v37 = vmul.f32 %v796_v43, %v606_v2  ;;  %v553_v15 = vsub.f32 %v497_v10, %v541_v1  ;;  %vm609_vm7 = vcmp.lt.f32.partialorder %v608_v0, 0.0004427343 }
  0x7f   : > { %v804_v5 = vpop.eup %803  ;;  %v577_v8 = vmul.f32 0.6931472, %v802_v59  ;;  %v554_v39 = vsub.f32 %v498_v25, %v550_v26  ;;  %v633_v10 = vlaneseq }
  0x80   : > { %v586_v30 = vmul.f32 0.6931472, %v804_v5  ;;  %v806_v32 = vpop.eup %805 }
  0x81   : > { %v583_v17 = vsel %vm1072_vm4, %v580_v56, %v577_v8  ;;  %v595_v40 = vmul.f32 0.6931472, %v806_v32  ;;  %v808_v38 = vpop.eup %807  ;;  %vm635_vm11 = vcmp.lt.s32.totalorder %v633_v10, 512 }
  0x82   : > { %v592_v21 = vsel %vm1076_vm5, %v589_v63, %v586_v30  ;;  %v611_v3 = vsub.f32 %v1044_v16, %v583_v17  ;;  %v604_v27 = vmul.f32 0.6931472, %v808_v38 }
  0x83   : > { %v612_v62 = vsub.f32 %v1046_v42, %v592_v21  ;;  %v601_v9 = vsel %vm600_vm6, %v598_v31, %v595_v40 }
  0x84   : > { %v613_v49 = vsub.f32 %v1052_v36, %v601_v9  ;;  %v610_v18 = vsel %vm609_vm7, %v607_v37, %v604_v27  ;;  %v615_v28 = vadd.f32 %v611_v3, %v551_v33 }
  0x85   : > { %v616_v50 = vadd.f32 %v612_v62, %v552_v41  ;;  %v614_v19 = vsub.f32 %v558_v24, %v610_v18 }
  0x86   : > { %v617_v20 = vadd.f32 %v613_v49, %v553_v15 }
  0x87   : > { %v623_v4 = vrot.slane %v616_v50, 7  ;;  %v618_v16 = vadd.f32 %v614_v19, %v554_v39 }
  0x88   : > { %v624_v43 = vrot.slane %v617_v20, 6 }
  0x89   : > { %v625_v42 = vrot.slane %v618_v16, 5  ;;  %v627_v29 = vsel %vm626_vm8, %v615_v28, %v623_v4 }
  0x8b   : > { %v629_v11 = vsel %vm628_vm9, %v624_v43, %v625_v42 }
  0x8c   : > { %v631_v25 = vsel %vm630_vm10, %v627_v29, %v629_v11 }
  0x8d   : > { %637 = vst.msk [vmem:[%s313_s26] sm:$0xf] %vm635_vm11, %v631_v25 }
  0x8e PF: > { %p10_p9 = scmp.ge.s32.totalorder %s870_s16, 4   ;;  %s1141_s12 = smov %s827_s13 }
  0x8f   : > { %s1142_s13 = smov %s879_s19  ;;  %s1143_s14 = smov %s870_s16 }
  0x90   :  { %12 = sbr.rel (!%p10_p9) target bundleno = 2 (0x2), region = 152 }

</bundles_post_ra>
